<compile_context>
chip_gen: v7x
topology: tpu7x:2x2x1
jax: 0.10.0
libtpu: 0.0.40
codegen_flags: <defaults>
</compile_context>

<pallas_src>
import jax
import jax.numpy as jnp
from jax.experimental import pallas as pl
from jax.experimental.pallas import tpu as pltpu


def decoder_kernel(x_ref, w1_ref, b1_ref, w2_ref, b2_ref, o_ref):
    # fc1 + ReLU  (MXU matmul, f32 accumulation)
    h = jnp.dot(x_ref[...], w1_ref[...], preferred_element_type=jnp.float32)
    h = jnp.maximum(h + b1_ref[...], 0.0)          # (TB, H) + (1, H) broadcast

    # fc2 + sigmoid  (sigmoid(y) == 0.5 * (tanh(y/2) + 1), single EUP op)
    y = jnp.dot(h, w2_ref[...], preferred_element_type=jnp.float32)
    y = y + b2_ref[...]                            # (TB, 784) + (1, 784)
    o_ref[...] = (0.5 * (jnp.tanh(0.5 * y) + 1.0)).astype(o_ref.dtype)


def decoder_forward(x, w1, b1, w2, b2, *, tb_max=1024):
    """x: (B, latent). w1: (latent, hidden) pre-transposed. w2: (hidden, 784).
    b1: (1, hidden), b2: (1, 784). Returns (B, 1, 28, 28) like the PyTorch module."""
    B, latent = x.shape
    hidden = w1.shape[1]
    out_features = w2.shape[1]
    assert out_features == 28 * 28, "input_size must be 784 for the 28x28 view"

    # Batch tile: multiple of 8 (sublane), capped so 2x (TB,784) f32 output
    # buffers stay comfortably under the v7x VMEM budget.
    TB = int(min(tb_max, max(8, ((B + 7) // 8) * 8)))
    n_blocks = pl.cdiv(B, TB)
    B_pad = n_blocks * TB
    if B_pad != B:
        x = jnp.pad(x, ((0, B_pad - B), (0, 0)))

    itemsize = 4  # f32
    weight_bytes = (latent * hidden + hidden * out_features
                    + hidden + out_features) * itemsize
    vmem_need = (2 * TB * (latent + out_features) * itemsize   # 2x in + 2x out tiles
                 + 2 * weight_bytes                            # resident weights (buffered)
                 + (2 << 20))                                  # slack
    vmem_limit = int(min(max(vmem_need, 32 << 20), 100 << 20))

    flops = 2 * B_pad * (latent * hidden + hidden * out_features)
    bytes_accessed = itemsize * (B_pad * (latent + out_features)) + weight_bytes

    out = pl.pallas_call(
        decoder_kernel,
        out_shape=jax.ShapeDtypeStruct((B_pad, out_features), jnp.float32),
        grid_spec=pltpu.PrefetchScalarGridSpec(
            num_scalar_prefetch=0,
            grid=(n_blocks,),
            in_specs=[
                pl.BlockSpec((TB, latent), lambda i: (i, 0)),            # x tile
                pl.BlockSpec((latent, hidden), lambda i: (0, 0)),        # w1 (resident)
                pl.BlockSpec((1, hidden), lambda i: (0, 0)),             # b1 (resident)
                pl.BlockSpec((hidden, out_features), lambda i: (0, 0)),  # w2 (resident)
                pl.BlockSpec((1, out_features), lambda i: (0, 0)),       # b2 (resident)
            ],
            out_specs=pl.BlockSpec((TB, out_features), lambda i: (i, 0)),
        ),
        compiler_params=pltpu.CompilerParams(
            dimension_semantics=("parallel",),
            vmem_limit_bytes=vmem_limit,
        ),
        cost_estimate=pl.CostEstimate(
            flops=flops,
            transcendentals=B_pad * out_features,
            bytes_accessed=bytes_accessed,
        ),
    )(x, w1, b1, w2, b2)

    if B_pad != B:
        out = out[:B]
    # PyTorch: x.view(-1, 1, 28, 28)  (row-major, NCHW)
    return out.reshape(-1, 1, 28, 28)


def init_decoder_params(key, latent_size, hidden_dim, input_size):
    """Deterministic init mimicking nn.Linear's U(-1/sqrt(fan_in), 1/sqrt(fan_in)).
    Weights stored pre-transposed as (in_features, out_features)."""
    k1, k2, k3, k4 = jax.random.split(key, 4)
    bound1 = 1.0 / jnp.sqrt(latent_size)
    bound2 = 1.0 / jnp.sqrt(hidden_dim)
    w1 = jax.random.uniform(k1, (latent_size, hidden_dim), jnp.float32, -bound1, bound1)
    b1 = jax.random.uniform(k2, (1, hidden_dim), jnp.float32, -bound1, bound1)
    w2 = jax.random.uniform(k3, (hidden_dim, input_size), jnp.float32, -bound2, bound2)
    b2 = jax.random.uniform(k4, (1, input_size), jnp.float32, -bound2, bound2)
    return w1, b1, w2, b2


if __name__ == "__main__":
    # Small, shape-consistent config: view(-1,1,28,28) => input_size = 784.
    batch = 8
    latent_size = 32
    hidden_dim = 128
    input_size = 28 * 28

    key = jax.random.PRNGKey(0)
    kx, kp = jax.random.split(key)

    x = jax.random.normal(kx, (batch, latent_size), dtype=jnp.float32)
    w1, b1, w2, b2 = init_decoder_params(kp, latent_size, hidden_dim, input_size)

    x_hat = decoder_forward(x, w1, b1, w2, b2)
    jax.block_until_ready(x_hat)

    # Sanity check against a pure-JAX reference of the same math.
    ref = jax.nn.sigmoid(
        jnp.maximum(x @ w1 + b1, 0.0) @ w2 + b2
    ).reshape(-1, 1, 28, 28)
    assert x_hat.shape == (batch, 1, 28, 28)
    assert jnp.allclose(x_hat, ref, atol=1e-5, rtol=1e-5)

    print("KERNEL_OK")
</pallas_src>

<mosaic_0001>
module attributes {stable_mosaic.version = 11 : i64} {
  func.func @decoder_kernel(%arg0: i32, %arg1: memref<8x32xf32, #tpu.memory_space<vmem>>, %arg2: memref<32x128xf32, #tpu.memory_space<vmem>>, %arg3: memref<1x128xf32, #tpu.memory_space<vmem>>, %arg4: memref<128x784xf32, #tpu.memory_space<vmem>>, %arg5: memref<1x784xf32, #tpu.memory_space<vmem>>, %arg6: memref<8x784xf32, #tpu.memory_space<vmem>>) attributes {dimension_semantics = [#tpu.dimension_semantics<parallel>], iteration_bounds = array<i64: 1>, scalar_prefetch = 0 : i64, scratch_operands = 0 : i64, tpu.core_type = #tpu.core_type<tc>, window_params = [{transform_indices = @transform_0, window_bounds = array<i64: 8, 32>}, {pipeline_mode = #tpu.pipeline_mode<synchronous>, transform_indices = @transform_1, window_bounds = array<i64: 32, 128>}, {pipeline_mode = #tpu.pipeline_mode<synchronous>, transform_indices = @transform_2, window_bounds = array<i64: 1, 128>}, {pipeline_mode = #tpu.pipeline_mode<synchronous>, transform_indices = @transform_3, window_bounds = array<i64: 128, 784>}, {pipeline_mode = #tpu.pipeline_mode<synchronous>, transform_indices = @transform_4, window_bounds = array<i64: 1, 784>}, {transform_indices = @transform_5, window_bounds = array<i64: 8, 784>}]} {
    %c0 = arith.constant 0 : index
    %c0_0 = arith.constant 0 : index
    %0 = vector.load %arg1[%c0, %c0_0] : memref<8x32xf32, #tpu.memory_space<vmem>>, vector<8x32xf32>
    %c0_1 = arith.constant 0 : index
    %c0_2 = arith.constant 0 : index
    %1 = vector.load %arg2[%c0_1, %c0_2] : memref<32x128xf32, #tpu.memory_space<vmem>>, vector<32x128xf32>
    %cst = arith.constant dense<0.000000e+00> : vector<8x128xf32>
    %2 = tpu.matmul %0, %1, %cst {dimension_numbers = #tpu.dot_dimension_numbers<[1], [0], [0], [1], [0, 0, 1, 1], [], []>} : vector<8x32xf32>, vector<32x128xf32>, vector<8x128xf32> -> vector<8x128xf32>
    %c0_3 = arith.constant 0 : index
    %c0_4 = arith.constant 0 : index
    %3 = vector.load %arg3[%c0_3, %c0_4] : memref<1x128xf32, #tpu.memory_space<vmem>>, vector<1x128xf32>
    %4 = vector.broadcast %3 : vector<1x128xf32> to vector<8x128xf32>
    %5 = arith.addf %2, %4 : vector<8x128xf32>
    %cst_5 = arith.constant 0.000000e+00 : f32
    %6 = vector.broadcast %cst_5 : f32 to vector<8x128xf32>
    %7 = arith.maximumf %5, %6 : vector<8x128xf32>
    %c0_6 = arith.constant 0 : index
    %c0_7 = arith.constant 0 : index
    %8 = vector.load %arg4[%c0_6, %c0_7] : memref<128x784xf32, #tpu.memory_space<vmem>>, vector<128x784xf32>
    %cst_8 = arith.constant dense<0.000000e+00> : vector<8x784xf32>
    %9 = tpu.matmul %7, %8, %cst_8 {dimension_numbers = #tpu.dot_dimension_numbers<[1], [0], [0], [1], [0, 0, 1, 1], [], []>} : vector<8x128xf32>, vector<128x784xf32>, vector<8x784xf32> -> vector<8x784xf32>
    %c0_9 = arith.constant 0 : index
    %c0_10 = arith.constant 0 : index
    %10 = vector.load %arg5[%c0_9, %c0_10] : memref<1x784xf32, #tpu.memory_space<vmem>>, vector<1x784xf32>
    %11 = vector.broadcast %10 : vector<1x784xf32> to vector<8x784xf32>
    %12 = arith.addf %9, %11 : vector<8x784xf32>
    %cst_11 = arith.constant 5.000000e-01 : f32
    %13 = vector.broadcast %cst_11 : f32 to vector<8x784xf32>
    %14 = arith.mulf %13, %12 : vector<8x784xf32>
    %15 = math.tanh %14 : vector<8x784xf32>
    %cst_12 = arith.constant 1.000000e+00 : f32
    %16 = vector.broadcast %cst_12 : f32 to vector<8x784xf32>
    %17 = arith.addf %15, %16 : vector<8x784xf32>
    %cst_13 = arith.constant 5.000000e-01 : f32
    %18 = vector.broadcast %cst_13 : f32 to vector<8x784xf32>
    %19 = arith.mulf %18, %17 : vector<8x784xf32>
    %c0_14 = arith.constant 0 : index
    %c0_15 = arith.constant 0 : index
    %20 = vector.load %arg6[%c0_14, %c0_15] : memref<8x784xf32, #tpu.memory_space<vmem>>, vector<8x784xf32>
    tpu.vector_store %arg6[%c0_14, %c0_15], %19 {strides = array<i32>} : memref<8x784xf32, #tpu.memory_space<vmem>>, vector<8x784xf32>,
    return
  }
  func.func @transform_0(%arg0: i32) -> (i32, i32) {
    %c0_i32 = arith.constant 0 : i32
    %c0_i32_0 = arith.constant 0 : i32
    return %arg0, %c0_i32 : i32, i32
  }
  func.func @transform_1(%arg0: i32) -> (i32, i32) {
    %c0_i32 = arith.constant 0 : i32
    %c0_i32_0 = arith.constant 0 : i32
    %c0_i32_1 = arith.constant 0 : i32
    return %c0_i32, %c0_i32_0 : i32, i32
  }
  func.func @transform_2(%arg0: i32) -> (i32, i32) {
    %c0_i32 = arith.constant 0 : i32
    %c0_i32_0 = arith.constant 0 : i32
    %c0_i32_1 = arith.constant 0 : i32
    return %c0_i32, %c0_i32_0 : i32, i32
  }
  func.func @transform_3(%arg0: i32) -> (i32, i32) {
    %c0_i32 = arith.constant 0 : i32
    %c0_i32_0 = arith.constant 0 : i32
    %c0_i32_1 = arith.constant 0 : i32
    return %c0_i32, %c0_i32_0 : i32, i32
  }
  func.func @transform_4(%arg0: i32) -> (i32, i32) {
    %c0_i32 = arith.constant 0 : i32
    %c0_i32_0 = arith.constant 0 : i32
    %c0_i32_1 = arith.constant 0 : i32
    return %c0_i32, %c0_i32_0 : i32, i32
  }
  func.func @transform_5(%arg0: i32) -> (i32, i32) {
    %c0_i32 = arith.constant 0 : i32
    %c0_i32_0 = arith.constant 0 : i32
    return %arg0, %c0_i32 : i32, i32
  }
}

</mosaic_0001>

<bundles_post_ra>
// kernel: tpu_custom_call.1
= control target key start
LH: loop header
LB: loop body
LE: loop exit
PB: predicated region body
PF: predicated region fallthrough
CT: control target
= control target key end

     0   :  { %v828_v3 = vmov 0.0|0.0   ;;  %vm829_vm0 = vmmov 0   ;;  %v830_v6 = vmov 0.0   ;;  %vm33_vm1 = vcmask 261120   ;;  %s1255_s0 = inlined_call_operand.vmem [shape: f32[8,32], index: 0, kind: input, shape index: {}]   ;;  %s1256_s1 = inlined_call_operand.vmem [shape: f32[32,128], index: 1, kind: input, shape index: {}]   ;;  %s1257_s2 = inlined_call_operand.vmem [shape: f32[1,128], index: 2, kind: input, shape index: {}]   ;;  %s1258_s3 = inlined_call_operand.vmem [shape: f32[128,784], index: 3, kind: input, shape index: {}]   ;;  %s1259_s4 = inlined_call_operand.vmem [shape: f32[1,784], index: 4, kind: input, shape index: {}]   ;;  %s1260_s5 = inlined_call_operand.hbm [shape: f32[8,784], index: 5, kind: output, shape index: {}]  }
   0x1   :  { %v22_v0 = vld [vmem:[%s1256_s1] sm:$0xff]  ;;  %v23_v1 = vld [vmem:[%s1256_s1 + $0x8] sm:$0xff]  ;;  %v24_v2 = vld [vmem:[%s1256_s1 + $0x10] sm:$0xff]  ;;  %660 = vmatprep.subr.bf16.mxu0 %v828_v3  ;;  %622 = vmatprep.mubr.msk.f32.mxu0 %vm829_vm0, %v830_v6 }
   0x2   :  { %v661_v4 = vpack.c.bf16 %v23_v1, %v22_v0  ;;  %v25_v5 = vld [vmem:[%s1256_s1 + $0x18] sm:$0xff]  ;;  %v109_v7 = vld [vmem:[%s1258_s3 + $0x8] sm:$0xff]  ;;  %v116_v8 = vld [vmem:[%s1258_s3 + $0x40] sm:$0xff]  ;;  %321 = vmatprep.mubr.f32.mxu1 %v830_v6 }
   0x3   :  { %v111_v9 = vld [vmem:[%s1258_s3 + $0x18] sm:$0xff]  ;;  %v118_v10 = vld [vmem:[%s1258_s3 + $0x50] sm:$0xff]  ;;  %v664_v11 = vpack.c.bf16 %v25_v5, %v24_v2  ;;  %v666_v12 = vpack.c.bf16 %v116_v8, %v109_v7  ;;  %v108_v13 = vld [vmem:[%s1258_s3] sm:$0xff] }
   0x4   :  { %662 = vmatpush3.bf16.msra.mxu0 %v661_v4  ;;  %v115_v14 = vld [vmem:[%s1258_s3 + $0x38] sm:$0xff]  ;;  %v110_v15 = vld [vmem:[%s1258_s3 + $0x10] sm:$0xff]  ;;  %v698_v16 = vpack.c.bf16 %v118_v10, %v111_v9  ;;  %v117_v18 = vld [vmem:[%s1258_s3 + $0x48] sm:$0xff] }
   0x5   :  { %663 = vmatprep.subr.bf16.mxu0 %v828_v3  ;;  %v668_v17 = vpack.c.bf16 %v115_v14, %v108_v13  ;;  %v123_v19 = vld [vmem:[%s1258_s3 + $0x78] sm:$0xff]  ;;  %v130_v20 = vld [vmem:[%s1258_s3 + $0xb0] sm:$0xff]  ;;  %667 = vmatprep.subr.bf16.mxu1 %v666_v12  ;;  %v125_v22 = vld [vmem:[%s1258_s3 + $0x88] sm:$0xff]  ;;  %v700_v27 = vpack.c.bf16 %v117_v18, %v110_v15 }
   0x6   :  { %v670_v21 = vpack.c.bf16 %v130_v20, %v123_v19  ;;  %v132_v23 = vld [vmem:[%s1258_s3 + $0xc0] sm:$0xff]  ;;  %v122_v24 = vld [vmem:[%s1258_s3 + $0x70] sm:$0xff]  ;;  %v129_v26 = vld [vmem:[%s1258_s3 + $0xa8] sm:$0xff] }
   0x7   :  { %v21_v25 = vld [vmem:[%s1255_s0] sm:$0xff]  ;;  %669 = vmatpush1.bf16.msra.mxu1 %v668_v17  ;;  %v672_v28 = vpack.c.bf16 %v129_v26, %v122_v24  ;;  %v137_v30 = vld [vmem:[%s1258_s3 + $0xe8] sm:$0xff]  ;;  %v702_v32 = vpack.c.bf16 %v132_v23, %v125_v22  ;;  %v131_v33 = vld [vmem:[%s1258_s3 + $0xb8] sm:$0xff] }
   0x8   :  { %665 = vmatpush3.bf16.msra.mxu0 %v664_v11  ;;  %671 = vmatprep.subr.bf16.mxu1 %v670_v21  ;;  %v124_v29 = vld [vmem:[%s1258_s3 + $0x80] sm:$0xff]  ;;  %v143_v36 = vld [vmem:[%s1258_s3 + $0x118] sm:$0xff]  ;;  %v146_v38 = vld [vmem:[%s1258_s3 + $0x130] sm:$0xff] }
   0x9   :  { %v144_v31 = vld [vmem:[%s1258_s3 + $0x120] sm:$0xff]  ;;  %699 = vmatprep.subr.bf16.mxu0 %v698_v16  ;;  %v139_v37 = vld [vmem:[%s1258_s3 + $0xf8] sm:$0xff]  ;;  %v158_v41 = vld [vmem:[%s1258_s3 + $0x190] sm:$0xff]  ;;  %v704_v42 = vpack.c.bf16 %v131_v33, %v124_v29 }
   0xa   :  { %v674_v34 = vpack.c.bf16 %v144_v31, %v137_v30  ;;  %v136_v35 = vld [vmem:[%s1258_s3 + $0xe0] sm:$0xff]  ;;  %v151_v39 = vld [vmem:[%s1258_s3 + $0x158] sm:$0xff]  ;;  %v138_v43 = vld [vmem:[%s1258_s3 + $0xf0] sm:$0xff]  ;;  %v706_v47 = vpack.c.bf16 %v146_v38, %v139_v37 }
   0xb   :  { %623 = vmatmul.mubr.msk.f32.vlgmr.msra.gmra.mrb[0].mxu0 %vm33_vm1, %v21_v25  ;;  %673 = vmatpush1.bf16.msra.mxu1 %v672_v28  ;;  %v676_v40 = vpack.c.bf16 %v143_v36, %v136_v35  ;;  %v678_v44 = vpack.c.bf16 %v158_v41, %v151_v39  ;;  %v150_v45 = vld [vmem:[%s1258_s3 + $0x150] sm:$0xff]  ;;  %v157_v46 = vld [vmem:[%s1258_s3 + $0x188] sm:$0xff]  ;;  %v172_v50 = vld [vmem:[%s1258_s3 + $0x200] sm:$0xff] }
   0xc   :  { %701 = vmatpush1.bf16.msra.mxu0 %v700_v27  ;;  %675 = vmatprep.subr.bf16.mxu1 %v674_v34  ;;  %v145_v48 = vld [vmem:[%s1258_s3 + $0x128] sm:$0xff]  ;;  %v160_v52 = vld [vmem:[%s1258_s3 + $0x1a0] sm:$0xff]  ;;  %v680_v53 = vpack.c.bf16 %v157_v46, %v150_v45  ;;  %v171_v58 = vld [vmem:[%s1258_s3 + $0x1f8] sm:$0xff] }
   0xd   :  { %703 = vmatprep.subr.bf16.mxu0 %v702_v32  ;;  %v165_v49 = vld [vmem:[%s1258_s3 + $0x1c8] sm:$0xff]  ;;  %392 = vmatprep.mubr.f32.mxu0 %v830_v6  ;;  %v708_v54 = vpack.c.bf16 %v145_v48, %v138_v43  ;;  %v152_v55 = vld [vmem:[%s1258_s3 + $0x160] sm:$0xff]  ;;  %v159_v60 = vld [vmem:[%s1258_s3 + $0x198] sm:$0xff] }
   0xe   :  { %v153_v51 = vld [vmem:[%s1258_s3 + $0x168] sm:$0xff]  ;;  %v682_v56 = vpack.c.bf16 %v172_v50, %v165_v49  ;;  %v164_v57 = vld [vmem:[%s1258_s3 + $0x1c0] sm:$0xff]  ;;  %v179_v61 = vld [vmem:[%s1258_s3 + $0x238] sm:$0xff]  ;;  %v712_v4 = vpack.c.bf16 %v159_v60, %v152_v55 }
   0xf   :  { %677 = vmatpush1.bf16.msra.mxu1 %v676_v40  ;;  %v710_v59 = vpack.c.bf16 %v160_v52, %v153_v51  ;;  %v186_v62 = vld [vmem:[%s1258_s3 + $0x270] sm:$0xff]  ;;  %v167_v63 = vld [vmem:[%s1258_s3 + $0x1d8] sm:$0xff]  ;;  %v684_v1 = vpack.c.bf16 %v171_v58, %v164_v57  ;;  %v173_v5 = vld [vmem:[%s1258_s3 + $0x208] sm:$0xff] }
  0x10   :  { %705 = vmatpush1.bf16.msra.mxu0 %v704_v42  ;;  %679 = vmatprep.subr.bf16.mxu1 %v678_v44  ;;  %v174_v0 = vld [vmem:[%s1258_s3 + $0x210] sm:$0xff]  ;;  %v686_v7 = vpack.c.bf16 %v186_v62, %v179_v61  ;;  %v185_v9 = vld [vmem:[%s1258_s3 + $0x268] sm:$0xff]  ;;  %v200_v12 = vld [vmem:[%s1258_s3 + $0x2e0] sm:$0xff] }
  0x11   :  { %707 = vmatprep.subr.bf16.mxu0 %v706_v47  ;;  %v166_v2 = vld [vmem:[%s1258_s3 + $0x1d0] sm:$0xff]  ;;  %v714_v10 = vpack.c.bf16 %v174_v0, %v167_v63  ;;  %v193_v11 = vld [vmem:[%s1258_s3 + $0x2a8] sm:$0xff] }
  0x12   :  { %v178_v8 = vld [vmem:[%s1258_s3 + $0x230] sm:$0xff] }
  0x13   :  { %681 = vmatpush1.bf16.msra.mxu1 %v680_v53 }
  0x14   :  { %709 = vmatpush1.bf16.msra.mxu0 %v708_v54  ;;  %683 = vmatprep.subr.bf16.mxu1 %v682_v56 }
  0x15   :  { %711 = vmatprep.subr.bf16.mxu0 %v710_v59 }
  0x16   :  { %10 = vsyncpa [#allocation3], 0  ;;  %v181_v13 = vld [vmem:[%s1258_s3 + $0x248] sm:$0xff]  ;;  %v188_v14 = vld [vmem:[%s1258_s3 + $0x280] sm:$0xff]  ;;  %v688_v15 = vpack.c.bf16 %v185_v9, %v178_v8  ;;  %v716_v16 = vpack.c.bf16 %v173_v5, %v166_v2  ;;  %v690_v17 = vpack.c.bf16 %v200_v12, %v193_v11  ;;  %vm574_vm2 = vcmask 130048  }
  0x17   :  { %685 = vmatpush1.bf16.msra.mxu1 %v684_v1  ;;  %v192_v18 = vld [vmem:[%s1258_s3 + $0x2a0] sm:$0xff]  ;;  %v199_v19 = vld [vmem:[%s1258_s3 + $0x2d8] sm:$0xff]  ;;  %v718_v20 = vpack.c.bf16 %v188_v14, %v181_v13  ;;  %v202_v24 = vld [vmem:[%s1258_s3 + $0x2f0] sm:$0xff] }
  0x18   :  { %713 = vmatpush1.bf16.msra.mxu0 %v712_v4  ;;  %687 = vmatprep.subr.bf16.mxu1 %v686_v7  ;;  %v180_v21 = vld [vmem:[%s1258_s3 + $0x240] sm:$0xff]  ;;  %v187_v22 = vld [vmem:[%s1258_s3 + $0x278] sm:$0xff]  ;;  %v692_v25 = vpack.c.bf16 %v199_v19, %v192_v18  ;;  %v194_v28 = vld [vmem:[%s1258_s3 + $0x2b0] sm:$0xff] }
  0x19   :  { %715 = vmatprep.subr.bf16.mxu0 %v714_v10  ;;  %v195_v23 = vld [vmem:[%s1258_s3 + $0x2b8] sm:$0xff]  ;;  %v720_v26 = vpack.c.bf16 %v187_v22, %v180_v21  ;;  %v201_v29 = vld [vmem:[%s1258_s3 + $0x2e8] sm:$0xff]  ;;  %v214_v32 = vld [vmem:[%s1258_s3 + $0x350] sm:$0xff] }
  0x1a   :  { %v722_v27 = vpack.c.bf16 %v202_v24, %v195_v23  ;;  %v724_v30 = vpack.c.bf16 %v201_v29, %v194_v28  ;;  %v207_v31 = vld [vmem:[%s1258_s3 + $0x318] sm:$0xff]  ;;  %v209_v33 = vld [vmem:[%s1258_s3 + $0x328] sm:$0xff]  ;;  %v216_v35 = vld [vmem:[%s1258_s3 + $0x360] sm:$0xff] }
  0x1b   :  { %689 = vmatpush1.bf16.msra.mxu1 %v688_v15  ;;  %v694_v34 = vpack.c.bf16 %v214_v32, %v207_v31  ;;  %v206_v36 = vld [vmem:[%s1258_s3 + $0x310] sm:$0xff]  ;;  %v213_v37 = vld [vmem:[%s1258_s3 + $0x348] sm:$0xff]  ;;  %v726_v38 = vpack.c.bf16 %v216_v35, %v209_v33  ;;  %v208_v40 = vld [vmem:[%s1258_s3 + $0x320] sm:$0xff] }
  0x1c   :  { %717 = vmatpush1.bf16.msra.mxu0 %v716_v16  ;;  %691 = vmatprep.subr.bf16.mxu1 %v690_v17  ;;  %v696_v39 = vpack.c.bf16 %v213_v37, %v206_v36  ;;  %v215_v41 = vld [vmem:[%s1258_s3 + $0x358] sm:$0xff]  ;;  %v113_v43 = vld [vmem:[%s1258_s3 + $0x28] sm:$0xff]  ;;  %v120_v44 = vld [vmem:[%s1258_s3 + $0x60] sm:$0xff] }
  0x1d   :  { %719 = vmatprep.subr.bf16.mxu0 %v718_v20  ;;  %v728_v42 = vpack.c.bf16 %v215_v41, %v208_v40  ;;  %v730_v45 = vpack.c.bf16 %v120_v44, %v113_v43  ;;  %v590_v46 = vld [vmem:[%s1257_s2] ss:$0 sm:$0xff]  ;;  %v119_v48 = vld [vmem:[%s1258_s3 + $0x58] sm:$0xff]  ;;  %v114_v49 = vld [vmem:[%s1258_s3 + $0x30] sm:$0xff] }
  0x1e   :  { %v112_v47 = vld [vmem:[%s1258_s3 + $0x20] sm:$0xff]  ;;  %v121_v50 = vld [vmem:[%s1258_s3 + $0x68] sm:$0xff]  ;;  %v127_v52 = vld [vmem:[%s1258_s3 + $0x98] sm:$0xff] }
  0x1f   :  { %693 = vmatpush1.bf16.msra.mxu1 %v692_v25  ;;  %v134_v53 = vld [vmem:[%s1258_s3 + $0xd0] sm:$0xff]  ;;  %v732_v56 = vpack.c.bf16 %v119_v48, %v112_v47  ;;  %v763_v57 = vpack.c.bf16 %v121_v50, %v114_v49  ;;  %v133_v61 = vld [vmem:[%s1258_s3 + $0xc8] sm:$0xff]  ;;  %v128_v62 = vld [vmem:[%s1258_s3 + $0xa0] sm:$0xff] }
  0x20   :  { %721 = vmatpush1.bf16.msra.mxu0 %v720_v26  ;;  %695 = vmatprep.subr.bf16.mxu1 %v694_v34  ;;  %v126_v58 = vld [vmem:[%s1258_s3 + $0x90] sm:$0xff]  ;;  %v734_v60 = vpack.c.bf16 %v134_v53, %v127_v52  ;;  %v135_v63 = vld [vmem:[%s1258_s3 + $0xd8] sm:$0xff]  ;;  %v141_v0 = vld [vmem:[%s1258_s3 + $0x108] sm:$0xff] }
  0x21   :  { %723 = vmatprep.subr.bf16.mxu0 %v722_v27  ;;  %v148_v1 = vld [vmem:[%s1258_s3 + $0x140] sm:$0xff]  ;;  %v736_v2 = vpack.c.bf16 %v133_v61, %v126_v58  ;;  %v766_v4 = vpack.c.bf16 %v135_v63, %v128_v62  ;;  %v147_v8 = vld [vmem:[%s1258_s3 + $0x138] sm:$0xff]  ;;  %v142_v9 = vld [vmem:[%s1258_s3 + $0x110] sm:$0xff] }
  0x22   :  { %v140_v5 = vld [vmem:[%s1258_s3 + $0x100] sm:$0xff]  ;;  %v738_v7 = vpack.c.bf16 %v148_v1, %v141_v0  ;;  %v149_v10 = vld [vmem:[%s1258_s3 + $0x148] sm:$0xff]  ;;  %v155_v11 = vld [vmem:[%s1258_s3 + $0x178] sm:$0xff] }
  0x23   :  { %697 = vmatpush1.bf16.msra.mxu1 %v696_v39  ;;  %v162_v12 = vld [vmem:[%s1258_s3 + $0x1b0] sm:$0xff]  ;;  %v740_v13 = vpack.c.bf16 %v147_v8, %v140_v5  ;;  %v769_v14 = vpack.c.bf16 %v149_v10, %v142_v9  ;;  %v161_v17 = vld [vmem:[%s1258_s3 + $0x1a8] sm:$0xff]  ;;  %v163_v18 = vld [vmem:[%s1258_s3 + $0x1b8] sm:$0xff] }
  0x24   :  { %725 = vmatpush1.bf16.msra.mxu0 %v724_v30  ;;  %731 = vmatprep.subr.bf16.mxu1 %v730_v45  ;;  %v154_v15 = vld [vmem:[%s1258_s3 + $0x170] sm:$0xff]  ;;  %v742_v16 = vpack.c.bf16 %v162_v12, %v155_v11  ;;  %v169_v19 = vld [vmem:[%s1258_s3 + $0x1e8] sm:$0xff]  ;;  %v176_v20 = vld [vmem:[%s1258_s3 + $0x220] sm:$0xff] }
  0x25   :  { %727 = vmatprep.subr.bf16.mxu0 %v726_v38  ;;  %v744_v21 = vpack.c.bf16 %v161_v17, %v154_v15  ;;  %v168_v23 = vld [vmem:[%s1258_s3 + $0x1e0] sm:$0xff]  ;;  %v746_v24 = vpack.c.bf16 %v176_v20, %v169_v19  ;;  %v175_v25 = vld [vmem:[%s1258_s3 + $0x218] sm:$0xff]  ;;  %v170_v26 = vld [vmem:[%s1258_s3 + $0x1f0] sm:$0xff] }
  0x26   :  { %v177_v27 = vld [vmem:[%s1258_s3 + $0x228] sm:$0xff]  ;;  %v183_v28 = vld [vmem:[%s1258_s3 + $0x258] sm:$0xff]  ;;  %v190_v29 = vld [vmem:[%s1258_s3 + $0x290] sm:$0xff]  ;;  %v748_v30 = vpack.c.bf16 %v175_v25, %v168_v23 }
  0x27   :  { %v775_v31 = vpack.c.bf16 %v177_v27, %v170_v26  ;;  %v182_v32 = vld [vmem:[%s1258_s3 + $0x250] sm:$0xff]  ;;  %v750_v33 = vpack.c.bf16 %v190_v29, %v183_v28  ;;  %v189_v34 = vld [vmem:[%s1258_s3 + $0x288] sm:$0xff]  ;;  %v184_v35 = vld [vmem:[%s1258_s3 + $0x260] sm:$0xff] }
  0x28   :  { %729 = vmatpush1.bf16.msra.mxu0 %v728_v42  ;;  %v191_v36 = vld [vmem:[%s1258_s3 + $0x298] sm:$0xff]  ;;  %v197_v37 = vld [vmem:[%s1258_s3 + $0x2c8] sm:$0xff]  ;;  %v204_v38 = vld [vmem:[%s1258_s3 + $0x300] sm:$0xff]  ;;  %v752_v39 = vpack.c.bf16 %v189_v34, %v182_v32 }
  0x29   :  { %762 = vmatprep.subr.bf16.mxu0 %v828_v3  ;;  %v778_v40 = vpack.c.bf16 %v191_v36, %v184_v35  ;;  %v196_v41 = vld [vmem:[%s1258_s3 + $0x2c0] sm:$0xff]  ;;  %v754_v42 = vpack.c.bf16 %v204_v38, %v197_v37  ;;  %v203_v43 = vld [vmem:[%s1258_s3 + $0x2f8] sm:$0xff]  ;;  %v198_v44 = vld [vmem:[%s1258_s3 + $0x2d0] sm:$0xff] }
  0x2a   :  { %v205_v45 = vld [vmem:[%s1258_s3 + $0x308] sm:$0xff]  ;;  %v218_v47 = vld [vmem:[%s1258_s3 + $0x370] sm:$0xff]  ;;  %v756_v48 = vpack.c.bf16 %v203_v43, %v196_v41  ;;  %v212_v53 = vld [vmem:[%s1258_s3 + $0x340] sm:$0xff] }
  0x2b   :  { %v781_v49 = vpack.c.bf16 %v205_v45, %v198_v44  ;;  %v210_v50 = vld [vmem:[%s1258_s3 + $0x330] sm:$0xff]  ;;  %v217_v52 = vld [vmem:[%s1258_s3 + $0x368] sm:$0xff]  ;;  %v220_v62 = vld [vmem:[%s1259_s4] sm:$0x7f] }
  0xde   :  { %v103_v51 = vpop.f32.mrb[0].mxu0 }
  0xdf   :  { %v104_v54 = vadd.f32 %v590_v46, %v103_v51  ;;  %v624_v55 = vpop.f32.mrb[1].mxu0  ;;  %v211_v46 = vld [vmem:[%s1258_s3 + $0x338] sm:$0xff] }
  0xe0   :  { %v758_v51 = vpack.c.bf16 %v218_v47, %v211_v46  ;;  %v760_v55 = vpack.c.bf16 %v217_v52, %v210_v50 }
  0xe1   :  { %v1107_v59 = vmax.f32 %v104_v54, 0.0  ;;  %v219_v54 = vld [vmem:[%s1258_s3 + $0x378] sm:$0xff] }
  0xe3   :  { %322 = vmatmul.mubr.f32.vlgmr.msra.gmra.mrb[0].mxu1 %v1107_v59  ;;  %393 = vmatmul.mubr.f32.vlgmr.msra.gmra.mrb[2].mxu0 %v1107_v59 }
  0xe4   :  { %733 = vmatpush1.bf16.msra.mxu1 %v732_v56  ;;  %764 = vmatpush3.bf16.msra.mxu0 %v763_v57  ;;  %v784_v56 = vpack.c.bf16 %v219_v54, %v212_v53  ;;  %v222_v57 = vlaneseq }
  0xe5   :  { %735 = vmatprep.subr.bf16.mxu1 %v734_v60  ;;  %765 = vmatprep.subr.bf16.mxu0 %v828_v3 }
  0xe6   :  { %463 = vmatprep.mubr.f32.mxu1 %v830_v6  ;;  %657 = vmatprep.mubr.msk.f32.mxu0 %vm829_vm0, %v830_v6  ;;  %v156_v6 = vld [vmem:[%s1258_s3 + $0x180] sm:$0xff]  ;;  %v223_v58 = vshrl.u32 %v222_v57, 7  ;;  %s831_s3 = smov [#allocation2]  }
  0xe7   :  { %v772_v22 = vpack.c.bf16 %v163_v18, %v156_v6  ;;  %s582_s4 = sshll.u32 %s831_s3, 4  ;;  %s583_s4 = int_to_ptr.vmem [resolvable:$true] %s582_s4 }
  0xe8   :  { %737 = vmatpush1.bf16.msra.mxu1 %v736_v2  ;;  %767 = vmatpush3.bf16.msra.mxu0 %v766_v4  ;;  %v224_v60 = vsub.s32 0, %v223_v58  ;;  %v232_v61 = vsub.s32 2, %v223_v58  ;;  %v228_v63 = vsub.s32 1, %v223_v58  ;;  %v236_v0 = vsub.s32 3, %v223_v58  ;;  %s804_s2 = scalar_lea.vmem %s583_s4, 896  ;;  %p809_p1 = scmp.lt.s32.totalorder %s583_s4, %s583_s4 }
  0xe9   :  { %739 = vmatprep.subr.bf16.mxu1 %v738_v7  ;;  %768 = vmatprep.subr.bf16.mxu0 %v828_v3  ;;  %v240_v28 = vsub.s32 4, %v223_v58  ;;  %v248_v29 = vsub.s32 6, %v223_v58  ;;  %p805_p0 = scmp.ne.s32.totalorder %s583_s4, %s804_s2  ;;  %p810_p2 = scmp.lt.s32.totalorder %s804_s2, %s804_s2 }
  0xea   :  { %v225_v1 = vrot.slane %v220_v62, %v224_v60  ;;  %v233_v2 = vrot.slane %v220_v62, %v232_v61  ;;  %v229_v4 = vrot.slane %v220_v62, %v228_v63 }
  0xeb   :  { %v249_v32 = vrot.slane %v220_v62, %v248_v29  ;;  %p811_p3 = por %p810_p2, %p809_p1 }
  0xec   :  { %741 = vmatpush1.bf16.msra.mxu1 %v740_v13  ;;  %770 = vmatpush3.bf16.msra.mxu0 %v769_v14 }
  0xed   :  { %743 = vmatprep.subr.bf16.mxu1 %v742_v16  ;;  %771 = vmatprep.subr.bf16.mxu0 %v828_v3  ;;  %p812_p4 = pnand %p811_p3, %p805_p0 }
  0xf0   :  { %745 = vmatpush1.bf16.msra.mxu1 %v744_v21  ;;  %773 = vmatpush3.bf16.msra.mxu0 %v772_v22 }
  0xf1   :  { %747 = vmatprep.subr.bf16.mxu1 %v746_v24  ;;  %774 = vmatprep.subr.bf16.mxu0 %v828_v3 }
  0xf4   :  { %749 = vmatpush1.bf16.msra.mxu1 %v748_v30  ;;  %776 = vmatpush3.bf16.msra.mxu0 %v775_v31  ;;  %v244_v30 = vsub.s32 5, %v223_v58  ;;  %v241_v31 = vrot.slane %v220_v62, %v240_v28 }
  0xf5   :  { %751 = vmatprep.subr.bf16.mxu1 %v750_v33  ;;  %777 = vmatprep.subr.bf16.mxu0 %v828_v3 }
  0xf6   :  { %v245_v33 = vrot.slane %v220_v62, %v244_v30 }
  0xf8   :  { %753 = vmatpush1.bf16.msra.mxu1 %v752_v39  ;;  %779 = vmatpush3.bf16.msra.mxu0 %v778_v40 }
  0xf9   :  { %755 = vmatprep.subr.bf16.mxu1 %v754_v42  ;;  %780 = vmatprep.subr.bf16.mxu0 %v828_v3 }
  0xfc   :  { %757 = vmatpush1.bf16.msra.mxu1 %v756_v48  ;;  %782 = vmatpush3.bf16.msra.mxu0 %v781_v49 }
  0xfd   :  { %759 = vmatprep.subr.bf16.mxu1 %v758_v51  ;;  %783 = vmatprep.subr.bf16.mxu0 %v828_v3  ;;  %v237_v3 = vrot.slane %v220_v62, %v236_v0 }
 0x100   :  { %761 = vmatpush1.bf16.msra.mxu1 %v760_v55  ;;  %785 = vmatpush3.bf16.msra.mxu0 %v784_v56 }
 0x103   :  { %464 = vmatmul.mubr.f32.vlgmr.msra.gmra.mrb[2].mxu1 %v1107_v59  ;;  %658 = vmatmul.mubr.f32.vlgmr.msra.gmra.mrb[4].mxu0 %v1107_v59 }
 0x1b6   :  { %v323_v5 = vpop.f32.mrb[0].mxu1  ;;  %v394_v7 = vpop.f32.mrb[2].mxu0 }
 0x1b7   :  { %v324_v8 = vadd.f32 %v323_v5, %v225_v1  ;;  %v395_v9 = vadd.f32 %v394_v7, %v233_v2  ;;  %v325_v10 = vpop.f32.mrb[1].mxu1  ;;  %v396_v59 = vpop.f32.mrb[3].mxu0 }
 0x1b8   :  { %v326_v11 = vadd.f32 %v325_v10, %v229_v4  ;;  %v397_v12 = vadd.f32 %v396_v59, %v237_v3 }
 0x1b9   :  { %v540_v13 = vmul.f32 0.5, %v324_v8  ;;  %v542_v14 = vmul.f32 0.5, %v395_v9 }
 0x1ba   :  { %v541_v15 = vmul.f32 0.5, %v326_v11  ;;  %v543_v16 = vmul.f32 0.5, %v397_v12 }
 0x1bb   :  { %790 = vtanh.f32 %v540_v13 }
 0x1bc   :  { %792 = vtanh.f32 %v542_v14 }
 0x1bd   :  { %794 = vtanh.f32 %v541_v15 }
 0x1be   :  { %796 = vtanh.f32 %v543_v16 }
 0x1c5   :  { %v791_v17 = vpop.eup %790 }
 0x1c6   :  { %v793_v6 = vpop.eup %792  ;;  %v554_v18 = vadd.f32 1.0, %v791_v17 }
 0x1c7   :  { %v795_v19 = vpop.eup %794  ;;  %v556_v20 = vadd.f32 1.0, %v793_v6 }
 0x1c8   :  { %v797_v21 = vpop.eup %796  ;;  %v561_v22 = vmul.f32 0.5, %v554_v18  ;;  %v555_v23 = vadd.f32 1.0, %v795_v19 }
 0x1c9   :  { %v563_v24 = vmul.f32 0.5, %v556_v20  ;;  %v557_v25 = vadd.f32 1.0, %v797_v21 }
 0x1ca   :  { %568 = vst [vmem:[#allocation2] sm:$0xff] %v561_v22  ;;  %v562_v26 = vmul.f32 0.5, %v555_v23 }
 0x1cb   :  { %570 = vst [vmem:[#allocation2 + $0x10] sm:$0xff] %v563_v24  ;;  %v564_v27 = vmul.f32 0.5, %v557_v25 }
 0x1cc   :  { %569 = vst [vmem:[#allocation2 + $0x8] sm:$0xff] %v562_v26 }
 0x1cd   :  { %571 = vst [vmem:[#allocation2 + $0x18] sm:$0xff] %v564_v27 }
 0x1d6   :  { %v465_v34 = vpop.f32.mrb[2].mxu1  ;;  %v536_v35 = vpop.f32.mrb[4].mxu0 }
 0x1d7   :  { %v466_v36 = vadd.f32 %v465_v34, %v241_v31  ;;  %v537_v37 = vadd.f32 %v536_v35, %v249_v32  ;;  %v467_v38 = vpop.f32.mrb[3].mxu1  ;;  %v659_v39 = vpop.f32.mrb[5].mxu0 }
 0x1d8   :  { %v468_v40 = vadd.f32 %v467_v38, %v245_v33 }
 0x1d9   :  { %v544_v41 = vmul.f32 0.5, %v466_v36  ;;  %v546_v42 = vmul.f32 0.5, %v537_v37 }
 0x1da   :  { %v545_v43 = vmul.f32 0.5, %v468_v40 }
 0x1db   :  { %798 = vtanh.f32 %v544_v41 }
 0x1dc   :  { %800 = vtanh.f32 %v546_v42 }
 0x1dd   :  { %802 = vtanh.f32 %v545_v43 }
 0x1e5   :  { %v799_v44 = vpop.eup %798 }
 0x1e6   :  { %v801_v45 = vpop.eup %800  ;;  %v558_v46 = vadd.f32 1.0, %v799_v44 }
 0x1e7   :  { %v803_v47 = vpop.eup %802  ;;  %v560_v48 = vadd.f32 1.0, %v801_v45 }
 0x1e8   :  { %v565_v49 = vmul.f32 0.5, %v558_v46  ;;  %v559_v50 = vadd.f32 1.0, %v803_v47 }
 0x1e9   :  { %v567_v51 = vmul.f32 0.5, %v560_v48 }
 0x1ea   :  { %572 = vst [vmem:[#allocation2 + $0x20] sm:$0xff] %v565_v49  ;;  %v566_v52 = vmul.f32 0.5, %v559_v50 }
 0x1eb   :  { %575 = vst.msk [vmem:[#allocation2 + $0x30] sm:$0xff] %vm574_vm2, %v567_v51 }
 0x1ec   :  { %573 = vst [vmem:[#allocation2 + $0x28] sm:$0xff] %v566_v52 }
 0x1ed   :  { %815 = shalt.err (!%p812_p4)
}
 0x1ee   :  { %s816_s13 = scalar_lea.hbm %s1260_s5, 896 }
 0x1ef   :  { %p817_p5 = scmp.ne.s32.totalorder %s1260_s5, %s816_s13  ;;  %p820_p6 = scmp.lt.u32.totalorder %s816_s13, %s1260_s5 }
 0x1f1   :  { %p822_p7 = pnand %p820_p6, %p817_p5 }
 0x1f3   :  { %825 = shalt.err (!%p822_p7)
}
 0x1f4   :  { %585 = dma.vmem_to_hbm [thread:$0]  %s583_s4, 896, %s1260_s5, [#allocation3]  }
 0x1f5   :  { %826 = dma.done.wait [#allocation3], 896  }
 0x1f6   :  { %827 = vsyncadd [#allocation3], 4294966400 }
 0x1f7   :  { %589 = vsyncpa [#allocation3], 1 }

</bundles_post_ra>
